<compile_context>
chip_gen: v7x
topology: tpu7x:2x2x1
jax: 0.10.0
libtpu: 0.0.40
codegen_flags: <defaults>
</compile_context>

<pallas_src>
import functools

import jax
import jax.numpy as jnp
from jax import lax
from jax.experimental import pallas as pl
from jax.experimental.pallas import tpu as pltpu


def _round_up(v, m):
    return (v + m - 1) // m * m


# Contract dim 1 of x[N,in] with dim 1 of w[out,in] (PyTorch layout, no transpose).
_DOT_DIMS = (((1,), (1,)), ((), ()))


# ---------------------------------------------------------------------------
# VMEM budgeting / tile derivation
# ---------------------------------------------------------------------------
def _vmem_budget():
    """Returns (vmem_limit_bytes for CompilerParams, byte budget for tile sizing)."""
    try:
        info = pltpu.get_tpu_info()
        phys = int(getattr(info, "vmem_capacity_bytes", 64 << 20))
    except Exception:  # query unavailable: assume the smallest generation (v7x, 64 MiB)
        phys = 64 << 20
    phys = min(max(phys, 32 << 20), 128 << 20)
    limit = max(phys - (16 << 20), 16 << 20)   # leave headroom for compiler scratch
    return limit, (limit * 3) // 4


def _derive_tiles(n, out_f, in_f, mm_bytes, out_bytes, budget):
    """Largest (tile_n, tile_out, tile_k) whose double-buffered footprint fits."""
    n_cap = _round_up(n, 8)
    out_cap = _round_up(out_f, 128)
    in_cap = _round_up(in_f, 128)
    # Note: 256-wide tiles already saturate every generation's MXU (v5e is 4x128^2,
    # v6e/v7x are 2x256^2); 512 only buys fewer grid steps / weight re-reads.
    tn_cands = sorted({t for t in (512, 256, 128, 64, 32, 16, 8) if t <= n_cap}
                      | ({n_cap} if n_cap <= 512 else set()), reverse=True)
    to_cands = sorted({t for t in (512, 256, 128) if t <= out_cap}
                      | ({out_cap} if out_cap <= 512 else set()), reverse=True)
    tk_cands = sorted({t for t in (2048, 1024, 512, 256, 128) if t <= in_cap}
                      | ({in_cap} if in_cap <= 2048 else set()), reverse=True)
    for tn in tn_cands:            # prefer large tile_n: fewer full-weight re-reads
        for to in to_cands:
            for tk in tk_cands:
                foot = ((2 * tn * tk + 2 * to * tk) * mm_bytes   # x/w double-buffered
                        + 2 * 8 * to * 4                          # packed params
                        + 2 * tn * to * out_bytes                 # output tile
                        + tn * to * 4)                            # f32 accumulator
                if foot <= budget:
                    return tn, to, tk
    return tn_cands[-1], 128, 128


def _bn_fused_fits(n_pad, in_pad, mm_bytes, out_bytes, budget, tile_out):
    foot = (2 * n_pad * in_pad * mm_bytes        # resident x (counted double-buffered)
            + 2 * tile_out * in_pad * mm_bytes   # weight feature tile
            + 2 * 8 * tile_out * 4               # packed params
            + 2 * n_pad * tile_out * out_bytes   # output tile
            + 4 * n_pad * tile_out * 4)          # in-kernel f32 temporaries
    return foot <= budget


# ---------------------------------------------------------------------------
# Padding / parameter packing helpers
# ---------------------------------------------------------------------------
def _pad2(a, shape, dtype):
    if a.shape == shape:
        return a if a.dtype == dtype else a.astype(dtype)
    return jnp.zeros(shape, dtype).at[:a.shape[0], :a.shape[1]].set(a.astype(dtype))


def _pack_params(bias, gamma, beta, out_pad):
    # bias / gamma / beta packed into one sublane-aligned (8, out_pad) block -> one DMA.
    p = jnp.zeros((8, out_pad), jnp.float32)
    p = p.at[0, :bias.shape[0]].set(bias.astype(jnp.float32))
    p = p.at[1, :gamma.shape[0]].set(gamma.astype(jnp.float32))
    p = p.at[2, :beta.shape[0]].set(beta.astype(jnp.float32))
    return p


def _activation(z, activation, negative_slope):
    if activation == "leaky_relu":
        return jnp.where(z >= 0, z, negative_slope * z)
    if activation == "relu":
        return jnp.maximum(z, 0.0)
    if activation == "tanh":
        return jnp.tanh(z)
    raise ValueError(f"unsupported activation: {activation}")


# ---------------------------------------------------------------------------
# Kernels
# ---------------------------------------------------------------------------
def _linear_kernel(x_ref, w_ref, p_ref, o_ref, acc_ref):
    """is_final=True: y = x @ w.T + b, K-tiled with an f32 accumulator."""
    @pl.when(pl.program_id(2) == 0)
    def _init():
        acc_ref[...] = jnp.zeros_like(acc_ref)

    acc_ref[...] += lax.dot_general(x_ref[...], w_ref[...], _DOT_DIMS,
                                    preferred_element_type=jnp.float32)

    @pl.when(pl.program_id(2) == pl.num_programs(2) - 1)
    def _fin():
        o_ref[...] = (acc_ref[...] + p_ref[0:1, :]).astype(o_ref.dtype)


def _linear_bn_act_kernel(x_ref, w_ref, p_ref, o_ref, *, n_real, activation,
                          negative_slope, eps):
    """is_final=False fused path: activation(BatchNorm1d(x @ w.T)), training-mode stats.

    Bias is dropped: BN subtracts the per-feature mean, so BN(xW^T + b) == BN(xW^T).
    Zero-padded batch rows give zero y rows -> they contribute nothing to the raw
    sums; we divide by the real batch size (padded output rows are sliced off).
    """
    y = lax.dot_general(x_ref[...], w_ref[...], _DOT_DIMS,
                        preferred_element_type=jnp.float32)
    inv_n = 1.0 / float(n_real)
    mean = jnp.sum(y, axis=0, keepdims=True) * inv_n
    mean_sq = jnp.sum(y * y, axis=0, keepdims=True) * inv_n
    var = jnp.maximum(mean_sq - mean * mean, 0.0)     # one-pass var, clamped >= 0
    scale = p_ref[1:2, :] * lax.rsqrt(var + eps)      # gamma * rsqrt(var+eps)
    shift = p_ref[2:3, :] - mean * scale              # beta - mean*scale
    z = _activation(y * scale + shift, activation, negative_slope)
    o_ref[...] = z.astype(o_ref.dtype)


def _mm_stats_kernel(x_ref, w_ref, y_ref, s_ref, acc_ref):
    """Two-pass BN, pass 1: K-tiled matmul; accumulate per-feature sum / sum-of-squares."""
    i = pl.program_id(1)
    k = pl.program_id(2)

    @pl.when((i == 0) & (k == 0))
    def _init_stats():
        s_ref[...] = jnp.zeros_like(s_ref)

    @pl.when(k == 0)
    def _init_acc():
        acc_ref[...] = jnp.zeros_like(acc_ref)

    acc_ref[...] += lax.dot_general(x_ref[...], w_ref[...], _DOT_DIMS,
                                    preferred_element_type=jnp.float32)

    @pl.when(k == pl.num_programs(2) - 1)
    def _fin():
        y = acc_ref[...]
        y_ref[...] = y
        s_ref[0:1, :] = s_ref[0:1, :] + jnp.sum(y, axis=0, keepdims=True)
        s_ref[1:2, :] = s_ref[1:2, :] + jnp.sum(y * y, axis=0, keepdims=True)


def _bn_apply_kernel(y_ref, s_ref, p_ref, o_ref, *, n_real, activation,
                     negative_slope, eps):
    """Two-pass BN, pass 2: elementwise scale/shift + activation (fully parallel)."""
    inv_n = 1.0 / float(n_real)
    mean = s_ref[0:1, :] * inv_n
    var = jnp.maximum(s_ref[1:2, :] * inv_n - mean * mean, 0.0)
    scale = p_ref[1:2, :] * lax.rsqrt(var + eps)
    shift = p_ref[2:3, :] - mean * scale
    z = _activation(y_ref[...] * scale + shift, activation, negative_slope)
    o_ref[...] = z.astype(o_ref.dtype)


# ---------------------------------------------------------------------------
# Wrapper
# ---------------------------------------------------------------------------
def linear_block(x, weight, bias, gamma, beta, *, is_final=True,
                 activation="leaky_relu", negative_slope=0.01, eps=1e-5,
                 use_bf16_matmul=False, bn_two_pass=None):
    """LinearBlock forward.

    x:      [N, in_features]
    weight: [out_features, in_features]  (PyTorch nn.Linear layout, NOT transposed)
    bias, gamma, beta: [out_features]
    use_bf16_matmul: cast x/w to bf16 (f32 accumulation) — ~3-4x MXU win on v6e/v7x.
    bn_two_pass: None = auto (footprint-gated), True/False = force the BN scheme.
    """
    n, in_f = x.shape
    out_f = weight.shape[0]
    out_dtype = x.dtype

    mm_dtype = jnp.bfloat16 if use_bf16_matmul else x.dtype
    mm_bytes = jnp.dtype(mm_dtype).itemsize
    out_bytes = jnp.dtype(out_dtype).itemsize

    vmem_limit, tile_budget = _vmem_budget()

    # ------------------------------------------------------------- is_final=True
    if is_final:
        tn, to, tk = _derive_tiles(n, out_f, in_f, mm_bytes, out_bytes, tile_budget)
        n_pad = _round_up(n, tn)
        out_pad = _round_up(out_f, to)
        in_pad = _round_up(in_f, tk)

        x_p = _pad2(x, (n_pad, in_pad), mm_dtype)
        w_p = _pad2(weight, (out_pad, in_pad), mm_dtype)
        params = _pack_params(bias, gamma, beta, out_pad)

        grid = (n_pad // tn, out_pad // to, in_pad // tk)
        cost = pl.CostEstimate(
            flops=2 * n_pad * in_pad * out_pad,
            transcendentals=0,
            bytes_accessed=(grid[1] * n_pad * in_pad + grid[0] * out_pad * in_pad) * mm_bytes
                           + n_pad * out_pad * out_bytes + 8 * out_pad * 4)

        out_p = pl.pallas_call(
            _linear_kernel,
            out_shape=jax.ShapeDtypeStruct((n_pad, out_pad), out_dtype),
            grid=grid,
            in_specs=[
                pl.BlockSpec((tn, tk), lambda i, j, k: (i, k)),
                pl.BlockSpec((to, tk), lambda i, j, k: (j, k)),
                pl.BlockSpec((8, to), lambda i, j, k: (0, j)),
            ],
            out_specs=pl.BlockSpec((tn, to), lambda i, j, k: (i, j)),
            scratch_shapes=[pltpu.VMEM((tn, to), jnp.float32)],
            compiler_params=pltpu.CompilerParams(
                dimension_semantics=("parallel", "parallel", "arbitrary"),
                vmem_limit_bytes=vmem_limit),
            cost_estimate=cost,
        )(x_p, w_p, params)
        return out_p[:n, :out_f]

    # ------------------------------------------------------------ is_final=False
    act_kw = dict(activation=activation, negative_slope=negative_slope, eps=eps)
    fused_tile_out = 128          # >=2 feature tiles whenever out_pad >= 256 (megacore)
    n_pad8 = _round_up(n, 8)
    in_pad128 = _round_up(in_f, 128)

    if bn_two_pass is None:
        use_fused = _bn_fused_fits(n_pad8, in_pad128, mm_bytes, out_bytes,
                                   tile_budget, fused_tile_out)
    else:
        use_fused = not bn_two_pass

    if use_fused:
        # Whole batch resident, grid over feature tiles only (exact full-batch stats).
        out_pad = _round_up(out_f, fused_tile_out)
        x_p = _pad2(x, (n_pad8, in_pad128), mm_dtype)
        w_p = _pad2(weight, (out_pad, in_pad128), mm_dtype)
        params = _pack_params(bias, gamma, beta, out_pad)

        cost = pl.CostEstimate(
            flops=2 * n_pad8 * in_pad128 * out_pad,
            transcendentals=out_pad,
            bytes_accessed=n_pad8 * in_pad128 * mm_bytes + out_pad * in_pad128 * mm_bytes
                           + n_pad8 * out_pad * out_bytes + 8 * out_pad * 4)

        kernel = functools.partial(_linear_bn_act_kernel, n_real=n, **act_kw)
        out_p = pl.pallas_call(
            kernel,
            out_shape=jax.ShapeDtypeStruct((n_pad8, out_pad), out_dtype),
            grid=(out_pad // fused_tile_out,),
            in_specs=[
                pl.BlockSpec((n_pad8, in_pad128), lambda j: (0, 0)),
                pl.BlockSpec((fused_tile_out, in_pad128), lambda j: (j, 0)),
                pl.BlockSpec((8, fused_tile_out), lambda j: (0, j)),
            ],
            out_specs=pl.BlockSpec((n_pad8, fused_tile_out), lambda j: (0, j)),
            compiler_params=pltpu.CompilerParams(
                dimension_semantics=("parallel",),
                vmem_limit_bytes=vmem_limit),
            cost_estimate=cost,
        )(x_p, w_p, params)
        return out_p[:n, :out_f]

    # Two-pass / N-tiled BN: pass 1 matmul + per-feature sum & sumsq accumulation,
    # pass 2 elementwise scale/shift + activation. Bounds VMEM for large N (v7x).
    tn, to, tk = _derive_tiles(n, out_f, in_f, mm_bytes, 4, tile_budget)
    n_pad = _round_up(n, tn)
    out_pad = _round_up(out_f, to)
    in_pad = _round_up(in_f, tk)

    x_p = _pad2(x, (n_pad, in_pad), mm_dtype)
    w_p = _pad2(weight, (out_pad, in_pad), mm_dtype)
    params = _pack_params(bias, gamma, beta, out_pad)

    grid1 = (out_pad // to, n_pad // tn, in_pad // tk)
    y_f32, stats = pl.pallas_call(
        _mm_stats_kernel,
        out_shape=(jax.ShapeDtypeStruct((n_pad, out_pad), jnp.float32),
                   jax.ShapeDtypeStruct((8, out_pad), jnp.float32)),
        grid=grid1,
        in_specs=[
            pl.BlockSpec((tn, tk), lambda j, i, k: (i, k)),
            pl.BlockSpec((to, tk), lambda j, i, k: (j, k)),
        ],
        out_specs=[
            pl.BlockSpec((tn, to), lambda j, i, k: (i, j)),
            pl.BlockSpec((8, to), lambda j, i, k: (0, j)),
        ],
        scratch_shapes=[pltpu.VMEM((tn, to), jnp.float32)],
        compiler_params=pltpu.CompilerParams(
            dimension_semantics=("parallel", "arbitrary", "arbitrary"),
            vmem_limit_bytes=vmem_limit),
    )(x_p, w_p)

    kernel2 = functools.partial(_bn_apply_kernel, n_real=n, **act_kw)
    out_p = pl.pallas_call(
        kernel2,
        out_shape=jax.ShapeDtypeStruct((n_pad, out_pad), out_dtype),
        grid=(n_pad // tn, out_pad // to),
        in_specs=[
            pl.BlockSpec((tn, to), lambda i, j: (i, j)),
            pl.BlockSpec((8, to), lambda i, j: (0, j)),
            pl.BlockSpec((8, to), lambda i, j: (0, j)),
        ],
        out_specs=pl.BlockSpec((tn, to), lambda i, j: (i, j)),
        compiler_params=pltpu.CompilerParams(
            dimension_semantics=("parallel", "parallel"),
            vmem_limit_bytes=vmem_limit),
    )(y_f32, stats, params)
    return out_p[:n, :out_f]


# ---------------------------------------------------------------------------
# Reference + demo
# ---------------------------------------------------------------------------
def _reference(x, weight, bias, gamma, beta, *, is_final, negative_slope=0.01, eps=1e-5):
    y = x @ weight.T + bias
    if not is_final:
        mean = jnp.mean(y, axis=0, keepdims=True)
        var = jnp.mean((y - mean) ** 2, axis=0, keepdims=True)
        y = (y - mean) / jnp.sqrt(var + eps) * gamma + beta
        y = jnp.where(y >= 0, y, negative_slope * y)
    return y


if __name__ == "__main__":
    key = jax.random.PRNGKey(0)
    k_x, k_w, k_b = jax.random.split(key, 3)

    batch, in_features, out_features = 8, 16, 32

    x = jax.random.normal(k_x, (batch, in_features), dtype=jnp.float32)
    bound = 1.0 / (in_features ** 0.5)
    weight = jax.random.uniform(k_w, (out_features, in_features),
                                minval=-bound, maxval=bound, dtype=jnp.float32)
    bias = jax.random.uniform(k_b, (out_features,),
                              minval=-bound, maxval=bound, dtype=jnp.float32)
    gamma = jnp.ones((out_features,), dtype=jnp.float32)   # BatchNorm1d weight
    beta = jnp.zeros((out_features,), dtype=jnp.float32)   # BatchNorm1d bias

    cases = [
        dict(is_final=True),                       # K-tiled pure-linear path
        dict(is_final=False),                      # fused whole-batch BN path
        dict(is_final=False, bn_two_pass=True),    # N-tiled two-pass BN path
    ]
    ok = True
    for kw in cases:
        out = jax.block_until_ready(linear_block(x, weight, bias, gamma, beta, **kw))
        ref = _reference(x, weight, bias, gamma, beta, is_final=kw["is_final"])
        if not jnp.allclose(out, ref, atol=1e-5, rtol=1e-5):
            ok = False

    if ok:
        print("KERNEL_OK")
</pallas_src>

<mosaic_0001>
module attributes {stable_mosaic.version = 11 : i64} {
  func.func @_linear_kernel(%arg0: i32, %arg1: i32, %arg2: i32, %arg3: memref<8x128xf32, #tpu.memory_space<vmem>>, %arg4: memref<128x128xf32, #tpu.memory_space<vmem>>, %arg5: memref<8x128xf32, #tpu.memory_space<vmem>>, %arg6: memref<8x128xf32, #tpu.memory_space<vmem>>, %arg7: memref<8x128xf32, #tpu.memory_space<vmem>>) attributes {dimension_semantics = [#tpu.dimension_semantics<parallel>, #tpu.dimension_semantics<parallel>, #tpu.dimension_semantics<arbitrary>], iteration_bounds = array<i64: 1, 1, 1>, scalar_prefetch = 0 : i64, scratch_operands = 1 : i64, tpu.core_type = #tpu.core_type<tc>, window_params = [{transform_indices = @transform_0, window_bounds = array<i64: 8, 128>}, {transform_indices = @transform_1, window_bounds = array<i64: 128, 128>}, {transform_indices = @transform_2, window_bounds = array<i64: 8, 128>}, {transform_indices = @transform_3, window_bounds = array<i64: 8, 128>}]} {
    %c0_i32 = arith.constant 0 : i32
    %0 = arith.cmpi eq, %arg2, %c0_i32 : i32
    %1 = arith.extui %0 : i1 to i32
    %c0_i32_0 = arith.constant 0 : i32
    %2 = arith.cmpi ne, %1, %c0_i32_0 : i32
    scf.if %2 {
      %cst_10 = arith.constant 0.000000e+00 : f32
      %12 = vector.broadcast %cst_10 : f32 to vector<8x128xf32>
      %c0_11 = arith.constant 0 : index
      %c0_12 = arith.constant 0 : index
      %13 = vector.load %arg7[%c0_11, %c0_12] : memref<8x128xf32, #tpu.memory_space<vmem>>, vector<8x128xf32>
      tpu.vector_store %arg7[%c0_11, %c0_12], %12 {strides = array<i32>} : memref<8x128xf32, #tpu.memory_space<vmem>>, vector<8x128xf32>,
    } else {
    }
    %c0 = arith.constant 0 : index
    %c0_1 = arith.constant 0 : index
    %3 = vector.load %arg7[%c0, %c0_1] : memref<8x128xf32, #tpu.memory_space<vmem>>, vector<8x128xf32>
    %c0_2 = arith.constant 0 : index
    %c0_3 = arith.constant 0 : index
    %4 = vector.load %arg3[%c0_2, %c0_3] : memref<8x128xf32, #tpu.memory_space<vmem>>, vector<8x128xf32>
    %c0_4 = arith.constant 0 : index
    %c0_5 = arith.constant 0 : index
    %5 = vector.load %arg4[%c0_4, %c0_5] : memref<128x128xf32, #tpu.memory_space<vmem>>, vector<128x128xf32>
    %cst = arith.constant dense<0.000000e+00> : vector<8x128xf32>
    %6 = tpu.matmul %4, %5, %cst {dimension_numbers = #tpu.dot_dimension_numbers<[1], [1], [0], [0], [0, 0, 1, 0], [], []>} : vector<8x128xf32>, vector<128x128xf32>, vector<8x128xf32> -> vector<8x128xf32>
    %7 = arith.addf %3, %6 : vector<8x128xf32>
    %c0_6 = arith.constant 0 : index
    %c0_7 = arith.constant 0 : index
    %8 = vector.load %arg7[%c0_6, %c0_7] : memref<8x128xf32, #tpu.memory_space<vmem>>, vector<8x128xf32>
    tpu.vector_store %arg7[%c0_6, %c0_7], %7 {strides = array<i32>} : memref<8x128xf32, #tpu.memory_space<vmem>>, vector<8x128xf32>,
    %c0_i32_8 = arith.constant 0 : i32
    %9 = arith.cmpi eq, %arg2, %c0_i32_8 : i32
    %10 = arith.extui %9 : i1 to i32
    %c0_i32_9 = arith.constant 0 : i32
    %11 = arith.cmpi ne, %10, %c0_i32_9 : i32
    scf.if %11 {
      %c0_10 = arith.constant 0 : index
      %c0_11 = arith.constant 0 : index
      %12 = vector.load %arg7[%c0_10, %c0_11] : memref<8x128xf32, #tpu.memory_space<vmem>>, vector<8x128xf32>
      %c0_12 = arith.constant 0 : index
      %c0_13 = arith.constant 0 : index
      %13 = vector.load %arg5[%c0_12, %c0_13] : memref<8x128xf32, #tpu.memory_space<vmem>>, vector<1x128xf32>
      %14 = vector.broadcast %13 : vector<1x128xf32> to vector<8x128xf32>
      %15 = arith.addf %12, %14 : vector<8x128xf32>
      %c0_14 = arith.constant 0 : index
      %c0_15 = arith.constant 0 : index
      %16 = vector.load %arg6[%c0_14, %c0_15] : memref<8x128xf32, #tpu.memory_space<vmem>>, vector<8x128xf32>
      tpu.vector_store %arg6[%c0_14, %c0_15], %15 {strides = array<i32>} : memref<8x128xf32, #tpu.memory_space<vmem>>, vector<8x128xf32>,
    } else {
    }
    return
  }
  func.func @transform_0(%arg0: i32, %arg1: i32, %arg2: i32) -> (i32, i32) {
    %c0_i32 = arith.constant 0 : i32
    return %arg0, %arg2 : i32, i32
  }
  func.func @transform_1(%arg0: i32, %arg1: i32, %arg2: i32) -> (i32, i32) {
    %c0_i32 = arith.constant 0 : i32
    return %arg1, %arg2 : i32, i32
  }
  func.func @transform_2(%arg0: i32, %arg1: i32, %arg2: i32) -> (i32, i32) {
    %c0_i32 = arith.constant 0 : i32
    %c0_i32_0 = arith.constant 0 : i32
    return %c0_i32, %arg1 : i32, i32
  }
  func.func @transform_3(%arg0: i32, %arg1: i32, %arg2: i32) -> (i32, i32) {
    %c0_i32 = arith.constant 0 : i32
    return %arg0, %arg1 : i32, i32
  }
}

</mosaic_0001>

<bundles_post_ra>
// kernel: tpu_custom_call.1
= control target key start
LH: loop header
LB: loop body
LE: loop exit
PB: predicated region body
PF: predicated region fallthrough
CT: control target
= control target key end

     0   :  { %8 = vsyncpa [#allocation4], 0  ;;  %s431_s0 = inlined_call_operand.hbm [shape: f32[8,128], index: 0, kind: input, shape index: {}]   ;;  %s432_s1 = inlined_call_operand.hbm [shape: f32[128,128], index: 1, kind: input, shape index: {}]   ;;  %s433_s2 = inlined_call_operand.hbm [shape: f32[8,128], index: 2, kind: input, shape index: {}]   ;;  %s434_s3 = inlined_call_operand.hbm [shape: f32[8,128], index: 3, kind: output, shape index: {}]  }
   0x1   :  { %9 = vsyncpa [#allocation7], 0 }
   0x2   :  { %10 = vsyncpa [#allocation5], 0  ;;  %s354_s12 = smov [#allocation6]   ;;  %s260_s16 = scalar_lea.hbm %s432_s1, 2048 }
   0x3   :  { %s26_s13 = sshll.u32 %s354_s12, 4  ;;  %p261_p0 = scmp.ne.s32.totalorder %s432_s1, %s260_s16  ;;  %s27_s13 = int_to_ptr.vmem [resolvable:$true] %s26_s13 }
   0x4   :  { %p264_p1 = scmp.lt.u32.totalorder %s260_s16, %s432_s1 }
   0x6   :  { %p266_p2 = pnand %p264_p1, %p261_p0 }
   0x8   :  { %269 = shalt.err (!%p266_p2)
}
   0x9   :  { %s270_s21 = scalar_lea.vmem %s27_s13, 2048  ;;  %p275_p4 = scmp.lt.s32.totalorder %s27_s13, %s27_s13 }
   0xa   :  { %p271_p3 = scmp.ne.s32.totalorder %s27_s13, %s270_s21  ;;  %p276_p5 = scmp.lt.s32.totalorder %s270_s21, %s270_s21 }
   0xc   :  { %p277_p6 = por %p276_p5, %p275_p4 }
   0xe   :  { %p278_p7 = pnand %p277_p6, %p271_p3 }
  0x10   :  { %281 = shalt.err (!%p278_p7)
}
  0x11   :  { %s355_s22 = smov 128   ;;  %s356_s23 = smov 8  }
  0x12   :  { %32 = dma.hbm_to_vmem [thread:$0]  %s432_s1, 2048, %s27_s13, [#allocation7], %s355_s22, %s355_s22, %s356_s23  }
  0x13   :  { %s357_s26 = smov [#allocation3]   ;;  %s358_s28 = smov [#allocation8]  }
  0x14   :  { %s17_s27 = sshll.u32 %s357_s26, 4  ;;  %s39_s29 = sshll.u32 %s358_s28, 4  ;;  %s18_s27 = int_to_ptr.vmem [resolvable:$true] %s17_s27  ;;  %s40_s29 = int_to_ptr.vmem [resolvable:$true] %s39_s29 }
  0x15   :  { %s282_s5 = scalar_lea.hbm %s431_s0, 128 }
  0x16   :  { %p283_p8 = scmp.ne.s32.totalorder %s431_s0, %s282_s5  ;;  %p286_p9 = scmp.lt.u32.totalorder %s282_s5, %s431_s0 }
  0x18   :  { %p288_p10 = pnand %p286_p9, %p283_p8 }
  0x1a   :  { %291 = shalt.err (!%p288_p10)
}
  0x1b   :  { %s292_s1 = scalar_lea.vmem %s18_s27, 128  ;;  %p297_p12 = scmp.lt.s32.totalorder %s18_s27, %s18_s27 }
  0x1c   :  { %p293_p11 = scmp.ne.s32.totalorder %s18_s27, %s292_s1  ;;  %p298_p13 = scmp.lt.s32.totalorder %s292_s1, %s292_s1 }
  0x1e   :  { %p299_p0 = por %p298_p13, %p297_p12 }
  0x20   :  { %p300_p1 = pnand %p299_p0, %p293_p11 }
  0x22   :  { %303 = shalt.err (!%p300_p1)
}
  0x23   :  { %20 = dma.hbm_to_vmem [thread:$0]  %s431_s0, 128, %s18_s27, [#allocation4]  }
  0x24   :  { %s304_s14 = scalar_lea.hbm %s433_s2, 128 }
  0x25   :  { %p305_p2 = scmp.ne.s32.totalorder %s433_s2, %s304_s14  ;;  %p308_p3 = scmp.lt.u32.totalorder %s304_s14, %s433_s2 }
  0x27   :  { %p310_p4 = pnand %p308_p3, %p305_p2 }
  0x29   :  { %313 = shalt.err (!%p310_p4)
}
  0x2a   :  { %s314_s19 = scalar_lea.vmem %s40_s29, 128  ;;  %p319_p6 = scmp.lt.s32.totalorder %s40_s29, %s40_s29 }
  0x2b   :  { %p315_p5 = scmp.ne.s32.totalorder %s40_s29, %s314_s19  ;;  %p320_p7 = scmp.lt.s32.totalorder %s314_s19, %s314_s19 }
  0x2d   :  { %p321_p8 = por %p320_p7, %p319_p6 }
  0x2f   :  { %p322_p9 = pnand %p321_p8, %p315_p5 }
  0x31   :  { %325 = shalt.err (!%p322_p9)
}
  0x32   :  { %42 = dma.hbm_to_vmem [thread:$0]  %s433_s2, 128, %s40_s29, [#allocation7]  }
  0x33   :  { %348 = dma.done.wait [#allocation4], 128  }
  0x34   :  { %349 = vsyncadd [#allocation4], 4294967168 }
  0x35   :  { %350 = dma.done.wait [#allocation7], 2176  }
  0x36   :  { %351 = vsyncadd [#allocation7], 4294965120  ;;  %v359_v0 = vmov 0.0|0.0   ;;  %vm360_vm0 = vmmov 0   ;;  %v361_v1 = vmov 0.0   ;;  %v59_v2 = vld [vmem:[#allocation6] sm:$0xff] }
  0x37   :  { %227 = vmatprep.subr.bf16.mxu0 %v359_v0  ;;  %224 = vmatprep.mubr.msk.f32.mxu0 %vm360_vm0, %v361_v1  ;;  %v60_v3 = vld [vmem:[#allocation6 + $0x8] sm:$0xff]  ;;  %v61_v5 = vld [vmem:[#allocation6 + $0x10] sm:$0xff]  ;;  %v62_v6 = vld [vmem:[#allocation6 + $0x18] sm:$0xff]  ;;  %s362_s2 = smov [#allocation9]  }
  0x38   :  { %v228_v4 = vpack.c.bf16 %v60_v3, %v59_v2  ;;  %v231_v7 = vpack.c.bf16 %v62_v6, %v61_v5  ;;  %v63_v8 = vld [vmem:[#allocation6 + $0x20] sm:$0xff]  ;;  %v64_v9 = vld [vmem:[#allocation6 + $0x28] sm:$0xff]  ;;  %v65_v11 = vld [vmem:[#allocation6 + $0x30] sm:$0xff]  ;;  %s164_s21 = sshll.u32 %s362_s2, 4  ;;  %s165_s21 = int_to_ptr.vmem [resolvable:$true] %s164_s21 }
  0x39   :  { %v234_v10 = vpack.c.bf16 %v64_v9, %v63_v8  ;;  %v66_v12 = vld [vmem:[#allocation6 + $0x38] sm:$0xff]  ;;  %v67_v14 = vld [vmem:[#allocation6 + $0x40] sm:$0xff]  ;;  %v68_v15 = vld [vmem:[#allocation6 + $0x48] sm:$0xff]  ;;  %s326_s22 = scalar_lea.vmem %s165_s21, 128  ;;  %p331_p11 = scmp.lt.s32.totalorder %s165_s21, %s165_s21 }
  0x3a   :  { %229 = vmatpush3.bf16.xpose.msra.mxu0 %v228_v4  ;;  %v237_v13 = vpack.c.bf16 %v66_v12, %v65_v11  ;;  %v240_v16 = vpack.c.bf16 %v68_v15, %v67_v14  ;;  %v69_v17 = vld [vmem:[#allocation6 + $0x50] sm:$0xff]  ;;  %v70_v18 = vld [vmem:[#allocation6 + $0x58] sm:$0xff]  ;;  %v71_v20 = vld [vmem:[#allocation6 + $0x60] sm:$0xff]  ;;  %p327_p10 = scmp.ne.s32.totalorder %s165_s21, %s326_s22  ;;  %p332_p12 = scmp.lt.s32.totalorder %s326_s22, %s326_s22 }
  0x3b   :  { %230 = vmatprep.subr.bf16.mxu0 %v359_v0  ;;  %v243_v19 = vpack.c.bf16 %v70_v18, %v69_v17  ;;  %v72_v21 = vld [vmem:[#allocation6 + $0x68] sm:$0xff]  ;;  %v73_v23 = vld [vmem:[#allocation6 + $0x70] sm:$0xff]  ;;  %v74_v24 = vld [vmem:[#allocation6 + $0x78] sm:$0xff] }
  0x3c   :  { %v246_v22 = vpack.c.bf16 %v72_v21, %v71_v20  ;;  %v249_v25 = vpack.c.bf16 %v74_v24, %v73_v23  ;;  %v58_v26 = vld [vmem:[#allocation3] sm:$0xff]  ;;  %v174_v27 = vld [vmem:[#allocation8] ss:$0 sm:$0xff]  ;;  %p333_p13 = por %p332_p12, %p331_p11 }
  0x3e   :  { %p334_p0 = pnand %p333_p13, %p327_p10 }
  0x42   :  { %232 = vmatpush3.bf16.xpose.msra.mxu0 %v231_v7 }
  0x43   :  { %233 = vmatprep.subr.bf16.mxu0 %v359_v0 }
  0x4a   :  { %235 = vmatpush3.bf16.xpose.msra.mxu0 %v234_v10 }
  0x4b   :  { %236 = vmatprep.subr.bf16.mxu0 %v359_v0 }
  0x52   :  { %238 = vmatpush3.bf16.xpose.msra.mxu0 %v237_v13 }
  0x53   :  { %239 = vmatprep.subr.bf16.mxu0 %v359_v0 }
  0x5a   :  { %241 = vmatpush3.bf16.xpose.msra.mxu0 %v240_v16 }
  0x5b   :  { %242 = vmatprep.subr.bf16.mxu0 %v359_v0 }
  0x62   :  { %244 = vmatpush3.bf16.xpose.msra.mxu0 %v243_v19 }
  0x63   :  { %245 = vmatprep.subr.bf16.mxu0 %v359_v0 }
  0x6a   :  { %247 = vmatpush3.bf16.xpose.msra.mxu0 %v246_v22 }
  0x6b   :  { %248 = vmatprep.subr.bf16.mxu0 %v359_v0 }
  0x72   :  { %250 = vmatpush3.bf16.xpose.msra.mxu0 %v249_v25 }
  0x79   :  { %225 = vmatmul.mubr.f32.vlgmr.msra.gmra.mrb[0].mxu0 %v58_v26 }
 0x14c   :  { %v141_v28 = vpop.f32.mrb[0].mxu0 }
 0x14d   :  { %v156_v29 = vadd.f32 %v174_v27, %v141_v28  ;;  %v226_v30 = vpop.f32.mrb[1].mxu0 }
 0x14f   :  { %157 = vst [vmem:[#allocation9] sm:$0xff] %v156_v29 }
 0x150   :  { %337 = shalt.err (!%p334_p0)
}
 0x151   :  { %s338_s25 = scalar_lea.hbm %s434_s3, 128 }
 0x152   :  { %p339_p1 = scmp.ne.s32.totalorder %s434_s3, %s338_s25  ;;  %p342_p2 = scmp.lt.u32.totalorder %s338_s25, %s434_s3 }
 0x154   :  { %p344_p3 = pnand %p342_p2, %p339_p1 }
 0x156   :  { %347 = shalt.err (!%p344_p3)
}
 0x157   :  { %167 = dma.vmem_to_hbm [thread:$0]  %s165_s21, 128, %s434_s3, [#allocation5]  }
 0x158   :  { %352 = dma.done.wait [#allocation5], 128  }
 0x159   :  { %353 = vsyncadd [#allocation5], 4294967168 }
 0x15a   :  { %171 = vsyncpa [#allocation4], 1 }
 0x15b   :  { %172 = vsyncpa [#allocation7], 1 }
 0x15c   :  { %173 = vsyncpa [#allocation5], 1 }

</bundles_post_ra>
